<compile_context>
chip_gen: v6e
topology: v6e:2x2x1
jax: 0.10.0
libtpu: 0.0.40
codegen_flags: <defaults>
</compile_context>

<pallas_src>
import functools

import jax
import jax.numpy as jnp
from jax.experimental import pallas as pl
from jax.experimental.pallas import tpu as pltpu

EPS = 1e-5
LANE = 128
SUBLANE = 8
VMEM_TILE_BUDGET = 24 * 1024 * 1024   # double-buffered working-set budget (all gens)


def _round_up(x, n):
    return ((x + n - 1) // n) * n


def _choose_tile_m(m, kp, coutp, requested):
    """M-tile size: multiple of 8 (sublane), bounded by a VMEM working-set budget,
    and capped so the grid keeps >= 2 steps when M allows it (v7x has 2 TensorCores
    and the M axis is marked "parallel")."""
    m8 = _round_up(m, SUBLANE)
    per_row = 2 * (kp + coutp) * 2                              # dbl-buffered bf16 rows
    fixed = 2 * (kp * coutp * 2 + coutp * 4 + 8 * coutp * 4)    # weights/bias/stats
    vmem_rows = max(LANE, (VMEM_TILE_BUDGET - fixed) // per_row)
    tile = min(requested, vmem_rows, m8)
    if m8 > 2 * LANE:                                           # keep >= 2 grid steps
        tile = min(tile, _round_up(pl.cdiv(m8, 2), LANE))
    if tile >= LANE:
        tile = (tile // LANE) * LANE
    return max(SUBLANE, _round_up(tile, SUBLANE))


# -----------------------------------------------------------------------------
# Single Pallas pass per conv stage:
#   conv-as-matmul (bf16 x bf16 -> f32 on the MXU) + bias + ReLU  -> y (bf16)
#   + per-tile BatchNorm partials: channel sum (row 0) and mean-centered
#     sum-of-squares (row 1) of the (8, Coutp) stats block.  Rows 2..7 are
#     don't-care padding (never read by the glue).
# -----------------------------------------------------------------------------
def _conv_relu_stats_kernel(p_ref, w_ref, b_ref, y_ref, stats_ref, *,
                            tile_m, rows_last):
    acc = jnp.dot(p_ref[...], w_ref[...], preferred_element_type=jnp.float32)
    y16 = jnp.maximum(acc + b_ref[...], 0.0).astype(jnp.bfloat16)
    y_ref[...] = y16                        # bf16 store: halves the dominant HBM stream
    y = y16.astype(jnp.float32)             # statistics on exactly the stored values

    def _write_stats(y_stat, n_rows, valid=None):
        s1 = jnp.sum(y_stat, axis=0, keepdims=True)             # (1, Coutp)
        mu = s1 * (1.0 / n_rows)
        d = y_stat - mu
        if valid is not None:
            d = jnp.where(valid, d, 0.0)
        stats_ref[0:1, :] = s1
        stats_ref[1:2, :] = jnp.sum(d * d, axis=0, keepdims=True)

    if rows_last == tile_m:
        # M divides the tile: no padded rows anywhere, no mask cost at all.
        _write_stats(y, tile_m)
    else:
        last = pl.num_programs(0) - 1

        @pl.when(pl.program_id(0) != last)
        def _():
            _write_stats(y, tile_m)

        @pl.when(pl.program_id(0) == last)      # only the final tile pays the mask
        def _():
            row = jax.lax.broadcasted_iota(jnp.int32, (tile_m, 1), 0)
            valid = row < rows_last
            _write_stats(jnp.where(valid, y, 0.0), rows_last, valid)


def _im2col(x_nhwc, stride):
    """3x3 / padding=1 im2col -> (N*Ho*Wo, 9*Cin), K ordered (dy, dx, cin)."""
    n, h, w, cin = x_nhwc.shape
    xp = jnp.pad(x_nhwc, ((0, 0), (1, 1), (1, 1), (0, 0)))
    ho = (h + 2 - 3) // stride + 1
    wo = (w + 2 - 3) // stride + 1
    cols = []
    for dy in range(3):
        for dx in range(3):
            cols.append(xp[:, dy:dy + (ho - 1) * stride + 1:stride,
                              dx:dx + (wo - 1) * stride + 1:stride, :])
    patches = jnp.stack(cols, axis=3).reshape(n * ho * wo, 9 * cin)
    return patches, (n, ho, wo)


def _conv_relu_bn_stage(x_nhwc, weight, bias, gamma, beta, stride, tile_m):
    """One Conv(3x3)+ReLU+BatchNorm stage.  Conv/ReLU/stats run in one tiled Pallas
    pass; the BN affine is left to the XLA glue so it fuses into the consumer
    (next stage's im2col / the final transpose) instead of an extra HBM pass."""
    cout, cin = weight.shape[0], weight.shape[1]

    # im2col materialized directly in bf16 (see TODO(synk) in the header).
    patches, (n, ho, wo) = _im2col(x_nhwc.astype(jnp.bfloat16), stride)
    m, k = patches.shape

    kp = _round_up(k, LANE)          # lane-dense contraction operand
    coutp = _round_up(cout, LANE)    # lane-dense (unmasked vst) output columns
    # (For compute-bound large-channel configs on v6e/v7x, 256-granularity padding /
    #  folding Wo into the lane axis are further options; memory-bound here.)
    tile_m = _choose_tile_m(m, kp, coutp, tile_m)
    num_tiles = pl.cdiv(m, tile_m)
    mp = num_tiles * tile_m
    rows_last = m - (num_tiles - 1) * tile_m

    patches_p = jnp.pad(patches, ((0, mp - m), (0, kp - k)))                 # bf16
    w_p = jnp.pad(jnp.transpose(weight, (2, 3, 1, 0)).reshape(k, cout),
                  ((0, kp - k), (0, coutp - cout))).astype(jnp.bfloat16)
    b_p = jnp.pad(bias, (0, coutp - cout)).reshape(1, coutp).astype(jnp.float32)

    # VMEM limit from the actual double-buffered footprint + headroom (not 64 MiB).
    per_step_bytes = (tile_m * kp * 2 + kp * coutp * 2 + coutp * 4
                      + tile_m * coutp * 2 + 8 * coutp * 4)
    compiler_params = pltpu.CompilerParams(
        dimension_semantics=("parallel",),
        vmem_limit_bytes=int(2 * per_step_bytes + (4 << 20)))

    kernel = functools.partial(_conv_relu_stats_kernel,
                               tile_m=tile_m, rows_last=rows_last)
    y_full, stats = pl.pallas_call(
        kernel,
        out_shape=(jax.ShapeDtypeStruct((mp, coutp), jnp.bfloat16),
                   jax.ShapeDtypeStruct((num_tiles * 8, coutp), jnp.float32)),
        grid=(num_tiles,),
        in_specs=[
            # (pipeline_mode=pl.Buffered(3) on the patches spec is an option if DMA
            #  is still exposed at large tile_m.)
            pl.BlockSpec((tile_m, kp), lambda i: (i, 0)),
            pl.BlockSpec((kp, coutp), lambda i: (0, 0)),
            pl.BlockSpec((1, coutp), lambda i: (0, 0)),
        ],
        out_specs=(
            pl.BlockSpec((tile_m, coutp), lambda i: (i, 0)),
            pl.BlockSpec((8, coutp), lambda i: (i, 0)),
        ),
        compiler_params=compiler_params,
        cost_estimate=pl.CostEstimate(
            flops=2 * mp * kp * coutp, transcendentals=0,
            bytes_accessed=(mp * kp * 2 + kp * coutp * 2 + coutp * 4
                            + mp * coutp * 2 + num_tiles * 8 * coutp * 4)),
    )(patches_p, w_p, b_p)

    # --- Chan-style combine of per-tile (sum, centered M2) partials -> batch stats.
    stats = stats.reshape(num_tiles, 8, coutp)
    s1_t = stats[:, 0, :cout]                                   # (T, cout)
    m2_t = stats[:, 1, :cout]
    counts = jnp.array([float(tile_m)] * (num_tiles - 1) + [float(rows_last)],
                       jnp.float32)[:, None]
    mean = jnp.sum(s1_t, axis=0) / float(m)
    m2 = jnp.sum(m2_t, axis=0) + jnp.sum(counts * jnp.square(s1_t / counts - mean),
                                         axis=0)
    var = m2 / float(m)                                         # biased (BN training)
    inv = jax.lax.rsqrt(var + EPS)
    scale = gamma.astype(jnp.float32) * inv
    shift = beta.astype(jnp.float32) - mean * scale

    # Padded M rows / channels hold relu(bias) garbage -> slice BEFORE any consumer.
    y = y_full[:m, :cout].reshape(n, ho, wo, cout).astype(jnp.float32)
    # BN affine applied here; XLA fuses it into the next stage's im2col (or the
    # final transpose), so it costs no extra HBM pass.
    return y * scale + shift


def cnn_block_forward(x_nchw, params, tile_m=2048):
    # x_nchw: (N, Cin, H, W) float32; returns (N, Cout, ceil(H/2), ceil(W/2)) float32
    x = jnp.transpose(x_nchw, (0, 2, 3, 1)).astype(jnp.float32)       # NHWC
    y = _conv_relu_bn_stage(x, params["w1"], params["b1"],
                            params["g1"], params["beta1"], stride=1, tile_m=tile_m)
    y = _conv_relu_bn_stage(y, params["w2"], params["b2"],
                            params["g2"], params["beta2"], stride=2, tile_m=tile_m)
    return jnp.transpose(y, (0, 3, 1, 2))                             # back to NCHW


def _reference_forward(x_nchw, params):
    # Pure-JAX reference matching the kernel's numerics: bf16 conv operands with f32
    # accumulation, bf16 activation storage, f32 batch-stat BatchNorm.
    def stage(x, w, b, g, beta, stride):
        y = jax.lax.conv_general_dilated(
            x.astype(jnp.bfloat16), w.astype(jnp.bfloat16),
            window_strides=(stride, stride), padding=((1, 1), (1, 1)),
            dimension_numbers=("NCHW", "OIHW", "NCHW"),
            preferred_element_type=jnp.float32)
        y = jnp.maximum(y + b[None, :, None, None], 0.0)
        y = y.astype(jnp.bfloat16).astype(jnp.float32)   # mirror bf16 activation store
        mean = jnp.mean(y, axis=(0, 2, 3), keepdims=True)
        var = jnp.mean(jnp.square(y - mean), axis=(0, 2, 3), keepdims=True)
        y = (y - mean) * jax.lax.rsqrt(var + EPS)
        return y * g[None, :, None, None] + beta[None, :, None, None]

    y = stage(x_nchw, params["w1"], params["b1"], params["g1"], params["beta1"], 1)
    y = stage(y, params["w2"], params["b2"], params["g2"], params["beta2"], 2)
    return y


def make_params(key, in_channels, out_channels):
    ks = jax.random.split(key, 8)
    return {
        "w1": 0.1 * jax.random.normal(ks[0], (out_channels, in_channels, 3, 3), jnp.float32),
        "b1": 0.1 * jax.random.normal(ks[1], (out_channels,), jnp.float32),
        "g1": 1.0 + 0.1 * jax.random.normal(ks[2], (out_channels,), jnp.float32),
        "beta1": 0.1 * jax.random.normal(ks[3], (out_channels,), jnp.float32),
        "w2": 0.1 * jax.random.normal(ks[4], (out_channels, out_channels, 3, 3), jnp.float32),
        "b2": 0.1 * jax.random.normal(ks[5], (out_channels,), jnp.float32),
        "g2": 1.0 + 0.1 * jax.random.normal(ks[6], (out_channels,), jnp.float32),
        "beta2": 0.1 * jax.random.normal(ks[7], (out_channels,), jnp.float32),
    }


if __name__ == "__main__":
    key = jax.random.PRNGKey(0)
    k_x1, k_x2, k_p = jax.random.split(key, 3)

    batch, in_channels, out_channels = 2, 4, 8
    params = make_params(k_p, in_channels, out_channels)
    fwd = jax.jit(cnn_block_forward)

    # spatial=16: clean multi-tile grid (2 tiles in stage 1, no masking);
    # spatial=18: exercises the masked last tile + unequal-count stats combine.
    for k_x, spatial in ((k_x1, 16), (k_x2, 18)):
        x = jax.random.normal(k_x, (batch, in_channels, spatial, spatial), jnp.float32)
        out = jax.block_until_ready(fwd(x, params))
        ref = _reference_forward(x, params)

        so = (spatial - 1) // 2 + 1
        assert out.shape == (batch, out_channels, so, so), out.shape
        max_err = float(jnp.max(jnp.abs(out - ref)))
        assert jnp.allclose(out, ref, atol=1e-2, rtol=1e-2), max_err

    print("KERNEL_OK")
</pallas_src>

<mosaic_0001>
module attributes {stable_mosaic.version = 11 : i64} {
  func.func @_conv_relu_stats_kernel(%arg0: i32, %arg1: memref<256x128xbf16, #tpu.memory_space<vmem>>, %arg2: memref<128x128xbf16, #tpu.memory_space<vmem>>, %arg3: memref<1x128xf32, #tpu.memory_space<vmem>>, %arg4: memref<256x128xbf16, #tpu.memory_space<vmem>>, %arg5: memref<8x128xf32, #tpu.memory_space<vmem>>) attributes {dimension_semantics = [#tpu.dimension_semantics<parallel>], iteration_bounds = array<i64: 2>, scalar_prefetch = 0 : i64, scratch_operands = 0 : i64, tpu.core_type = #tpu.core_type<tc>, window_params = [{transform_indices = @transform_0, window_bounds = array<i64: 256, 128>}, {pipeline_mode = #tpu.pipeline_mode<synchronous>, transform_indices = @transform_1, window_bounds = array<i64: 128, 128>}, {pipeline_mode = #tpu.pipeline_mode<synchronous>, transform_indices = @transform_2, window_bounds = array<i64: 1, 128>}, {transform_indices = @transform_3, window_bounds = array<i64: 256, 128>}, {transform_indices = @transform_4, window_bounds = array<i64: 8, 128>}]} {
    %c0 = arith.constant 0 : index
    %c0_0 = arith.constant 0 : index
    %0 = vector.load %arg1[%c0, %c0_0] : memref<256x128xbf16, #tpu.memory_space<vmem>>, vector<256x128xbf16>
    %c0_1 = arith.constant 0 : index
    %c0_2 = arith.constant 0 : index
    %1 = vector.load %arg2[%c0_1, %c0_2] : memref<128x128xbf16, #tpu.memory_space<vmem>>, vector<128x128xbf16>
    %cst = arith.constant dense<0.000000e+00> : vector<256x128xf32>
    %2 = tpu.matmul %0, %1, %cst {dimension_numbers = #tpu.dot_dimension_numbers<[1], [0], [0], [1], [0, 0, 1, 1], [], []>} : vector<256x128xbf16>, vector<128x128xbf16>, vector<256x128xf32> -> vector<256x128xf32>
    %c0_3 = arith.constant 0 : index
    %c0_4 = arith.constant 0 : index
    %3 = vector.load %arg3[%c0_3, %c0_4] : memref<1x128xf32, #tpu.memory_space<vmem>>, vector<1x128xf32>
    %4 = vector.broadcast %3 : vector<1x128xf32> to vector<256x128xf32>
    %5 = arith.addf %2, %4 : vector<256x128xf32>
    %cst_5 = arith.constant 0.000000e+00 : f32
    %6 = vector.broadcast %cst_5 : f32 to vector<256x128xf32>
    %7 = arith.maximumf %5, %6 : vector<256x128xf32>
    %8 = arith.truncf %7 : vector<256x128xf32> to vector<256x128xbf16>
    %c0_6 = arith.constant 0 : index
    %c0_7 = arith.constant 0 : index
    %9 = vector.load %arg4[%c0_6, %c0_7] : memref<256x128xbf16, #tpu.memory_space<vmem>>, vector<256x128xbf16>
    tpu.vector_store %arg4[%c0_6, %c0_7], %8 {strides = array<i32>} : memref<256x128xbf16, #tpu.memory_space<vmem>>, vector<256x128xbf16>,
    %10 = arith.extf %8 : vector<256x128xbf16> to vector<256x128xf32>
    %cst_8 = arith.constant dense<0.000000e+00> : vector<128xf32>
    %11 = vector.multi_reduction <add>, %10, %cst_8 [0] : vector<256x128xf32> to vector<128xf32>
    %12 = vector.shape_cast %11 : vector<128xf32> to vector<1x128xf32>
    %cst_9 = arith.constant 3.906250e-03 : f32
    %13 = vector.broadcast %cst_9 : f32 to vector<1x128xf32>
    %14 = arith.mulf %12, %13 : vector<1x128xf32>
    %15 = vector.broadcast %14 : vector<1x128xf32> to vector<256x128xf32>
    %16 = arith.subf %10, %15 : vector<256x128xf32>
    %c0_10 = arith.constant 0 : index
    %c0_11 = arith.constant 0 : index
    %17 = vector.load %arg5[%c0_10, %c0_11] : memref<8x128xf32, #tpu.memory_space<vmem>>, vector<1x128xf32>
    tpu.vector_store %arg5[%c0_10, %c0_11], %12 {strides = array<i32>} : memref<8x128xf32, #tpu.memory_space<vmem>>, vector<1x128xf32>,
    %18 = arith.mulf %16, %16 : vector<256x128xf32>
    %cst_12 = arith.constant dense<0.000000e+00> : vector<128xf32>
    %19 = vector.multi_reduction <add>, %18, %cst_12 [0] : vector<256x128xf32> to vector<128xf32>
    %20 = vector.shape_cast %19 : vector<128xf32> to vector<1x128xf32>
    %c1 = arith.constant 1 : index
    %c0_13 = arith.constant 0 : index
    %21 = vector.load %arg5[%c1, %c0_13] : memref<8x128xf32, #tpu.memory_space<vmem>>, vector<1x128xf32>
    tpu.vector_store %arg5[%c1, %c0_13], %20 {strides = array<i32>} : memref<8x128xf32, #tpu.memory_space<vmem>>, vector<1x128xf32>,
    return
  }
  func.func @transform_0(%arg0: i32) -> (i32, i32) {
    %c0_i32 = arith.constant 0 : i32
    %c0_i32_0 = arith.constant 0 : i32
    return %arg0, %c0_i32 : i32, i32
  }
  func.func @transform_1(%arg0: i32) -> (i32, i32) {
    %c0_i32 = arith.constant 0 : i32
    %c0_i32_0 = arith.constant 0 : i32
    %c0_i32_1 = arith.constant 0 : i32
    return %c0_i32, %c0_i32_0 : i32, i32
  }
  func.func @transform_2(%arg0: i32) -> (i32, i32) {
    %c0_i32 = arith.constant 0 : i32
    %c0_i32_0 = arith.constant 0 : i32
    %c0_i32_1 = arith.constant 0 : i32
    return %c0_i32, %c0_i32_0 : i32, i32
  }
  func.func @transform_3(%arg0: i32) -> (i32, i32) {
    %c0_i32 = arith.constant 0 : i32
    %c0_i32_0 = arith.constant 0 : i32
    return %arg0, %c0_i32 : i32, i32
  }
  func.func @transform_4(%arg0: i32) -> (i32, i32) {
    %c0_i32 = arith.constant 0 : i32
    %c0_i32_0 = arith.constant 0 : i32
    return %arg0, %c0_i32 : i32, i32
  }
}

module attributes {stable_mosaic.version = 11 : i64} {
  func.func @_conv_relu_stats_kernel(%arg0: i32, %arg1: memref<128x128xbf16, #tpu.memory_space<vmem>>, %arg2: memref<128x128xbf16, #tpu.memory_space<vmem>>, %arg3: memref<1x128xf32, #tpu.memory_space<vmem>>, %arg4: memref<128x128xbf16, #tpu.memory_space<vmem>>, %arg5: memref<8x128xf32, #tpu.memory_space<vmem>>) attributes {dimension_semantics = [#tpu.dimension_semantics<parallel>], iteration_bounds = array<i64: 1>, scalar_prefetch = 0 : i64, scratch_operands = 0 : i64, tpu.core_type = #tpu.core_type<tc>, window_params = [{transform_indices = @transform_0, window_bounds = array<i64: 128, 128>}, {pipeline_mode = #tpu.pipeline_mode<synchronous>, transform_indices = @transform_1, window_bounds = array<i64: 128, 128>}, {pipeline_mode = #tpu.pipeline_mode<synchronous>, transform_indices = @transform_2, window_bounds = array<i64: 1, 128>}, {transform_indices = @transform_3, window_bounds = array<i64: 128, 128>}, {transform_indices = @transform_4, window_bounds = array<i64: 8, 128>}]} {
    %c0 = arith.constant 0 : index
    %c0_0 = arith.constant 0 : index
    %0 = vector.load %arg1[%c0, %c0_0] : memref<128x128xbf16, #tpu.memory_space<vmem>>, vector<128x128xbf16>
    %c0_1 = arith.constant 0 : index
    %c0_2 = arith.constant 0 : index
    %1 = vector.load %arg2[%c0_1, %c0_2] : memref<128x128xbf16, #tpu.memory_space<vmem>>, vector<128x128xbf16>
    %cst = arith.constant dense<0.000000e+00> : vector<128x128xf32>
    %2 = tpu.matmul %0, %1, %cst {dimension_numbers = #tpu.dot_dimension_numbers<[1], [0], [0], [1], [0, 0, 1, 1], [], []>} : vector<128x128xbf16>, vector<128x128xbf16>, vector<128x128xf32> -> vector<128x128xf32>
    %c0_3 = arith.constant 0 : index
    %c0_4 = arith.constant 0 : index
    %3 = vector.load %arg3[%c0_3, %c0_4] : memref<1x128xf32, #tpu.memory_space<vmem>>, vector<1x128xf32>
    %4 = vector.broadcast %3 : vector<1x128xf32> to vector<128x128xf32>
    %5 = arith.addf %2, %4 : vector<128x128xf32>
    %cst_5 = arith.constant 0.000000e+00 : f32
    %6 = vector.broadcast %cst_5 : f32 to vector<128x128xf32>
    %7 = arith.maximumf %5, %6 : vector<128x128xf32>
    %8 = arith.truncf %7 : vector<128x128xf32> to vector<128x128xbf16>
    %c0_6 = arith.constant 0 : index
    %c0_7 = arith.constant 0 : index
    %9 = vector.load %arg4[%c0_6, %c0_7] : memref<128x128xbf16, #tpu.memory_space<vmem>>, vector<128x128xbf16>
    tpu.vector_store %arg4[%c0_6, %c0_7], %8 {strides = array<i32>} : memref<128x128xbf16, #tpu.memory_space<vmem>>, vector<128x128xbf16>,
    %10 = arith.extf %8 : vector<128x128xbf16> to vector<128x128xf32>
    %cst_8 = arith.constant dense<0.000000e+00> : vector<128xf32>
    %11 = vector.multi_reduction <add>, %10, %cst_8 [0] : vector<128x128xf32> to vector<128xf32>
    %12 = vector.shape_cast %11 : vector<128xf32> to vector<1x128xf32>
    %cst_9 = arith.constant 7.812500e-03 : f32
    %13 = vector.broadcast %cst_9 : f32 to vector<1x128xf32>
    %14 = arith.mulf %12, %13 : vector<1x128xf32>
    %15 = vector.broadcast %14 : vector<1x128xf32> to vector<128x128xf32>
    %16 = arith.subf %10, %15 : vector<128x128xf32>
    %c0_10 = arith.constant 0 : index
    %c0_11 = arith.constant 0 : index
    %17 = vector.load %arg5[%c0_10, %c0_11] : memref<8x128xf32, #tpu.memory_space<vmem>>, vector<1x128xf32>
    tpu.vector_store %arg5[%c0_10, %c0_11], %12 {strides = array<i32>} : memref<8x128xf32, #tpu.memory_space<vmem>>, vector<1x128xf32>,
    %18 = arith.mulf %16, %16 : vector<128x128xf32>
    %cst_12 = arith.constant dense<0.000000e+00> : vector<128xf32>
    %19 = vector.multi_reduction <add>, %18, %cst_12 [0] : vector<128x128xf32> to vector<128xf32>
    %20 = vector.shape_cast %19 : vector<128xf32> to vector<1x128xf32>
    %c1 = arith.constant 1 : index
    %c0_13 = arith.constant 0 : index
    %21 = vector.load %arg5[%c1, %c0_13] : memref<8x128xf32, #tpu.memory_space<vmem>>, vector<1x128xf32>
    tpu.vector_store %arg5[%c1, %c0_13], %20 {strides = array<i32>} : memref<8x128xf32, #tpu.memory_space<vmem>>, vector<1x128xf32>,
    return
  }
  func.func @transform_0(%arg0: i32) -> (i32, i32) {
    %c0_i32 = arith.constant 0 : i32
    %c0_i32_0 = arith.constant 0 : i32
    return %arg0, %c0_i32 : i32, i32
  }
  func.func @transform_1(%arg0: i32) -> (i32, i32) {
    %c0_i32 = arith.constant 0 : i32
    %c0_i32_0 = arith.constant 0 : i32
    %c0_i32_1 = arith.constant 0 : i32
    return %c0_i32, %c0_i32_0 : i32, i32
  }
  func.func @transform_2(%arg0: i32) -> (i32, i32) {
    %c0_i32 = arith.constant 0 : i32
    %c0_i32_0 = arith.constant 0 : i32
    %c0_i32_1 = arith.constant 0 : i32
    return %c0_i32, %c0_i32_0 : i32, i32
  }
  func.func @transform_3(%arg0: i32) -> (i32, i32) {
    %c0_i32 = arith.constant 0 : i32
    %c0_i32_0 = arith.constant 0 : i32
    return %arg0, %c0_i32 : i32, i32
  }
  func.func @transform_4(%arg0: i32) -> (i32, i32) {
    %c0_i32 = arith.constant 0 : i32
    %c0_i32_0 = arith.constant 0 : i32
    return %arg0, %c0_i32 : i32, i32
  }
}

</mosaic_0001>

<bundles_post_ra>
// kernel: cnn_block_forward.2
= control target key start
LH: loop header
LB: loop body
LE: loop exit
PB: predicated region body
PF: predicated region fallthrough
CT: control target
= control target key end

     0   :  { %s1374_s15 = smov 0   ;;  %s1749_s0 = inlined_call_operand.vmem [shape: bf16[512,128], index: 0, kind: input, shape index: {}]   ;;  %s1750_s1 = inlined_call_operand.vmem [shape: bf16[128,128], index: 1, kind: input, shape index: {}]   ;;  %s1751_s2 = inlined_call_operand.vmem [shape: f32[1,128], index: 2, kind: input, shape index: {}]   ;;  %s1752_s3 = inlined_call_operand.vmem [shape: bf16[512,128], index: 3, kind: output, shape index: {0}]   ;;  %s1753_s4 = inlined_call_operand.vmem [shape: f32[16,128], index: 4, kind: output, shape index: {1}]  }
   0x1 LB: > { %s1380_s16 = sadd.s32 4294967295, %s1347_s15   ;;  %p1029_p0 = scmp.ge.s32.totalorder %s1347_s15, 1  ;;  %s1347_s15 = sphi %s1374_s15, %s15_s15  }
   0x2   : > { %p166_p1 = scmp.lt.s32.totalorder %s1347_s15, 3 }
   0x4   : > { %p167_p2 = pnand %p1029_p0, %p166_p1 }
   0x5   : > { %s1030_s19 = sshll.u32 (!%p167_p2), %s1380_s16, 5  ;;  %p208_p4 = scmp.lt.s32.totalorder (!%p167_p2), %s1380_s16, 1 }
   0x6   : > { %170 = sbr.rel (%p167_p2) target bundleno = 408 (0x198), region = 32  ;;  %p197_p3 = scmp.lt.s32.totalorder (!%p167_p2), %s1030_s19, 63 }
   0xb   : > { %v1317_v0 = vld [vmem:[%s1750_s1 + $0x38] sm:$0xff]   ;;  %v1318_v1 = vld [vmem:[%s1750_s1 + $0x30] sm:$0xff]   ;;  %s1755_s19 = smov (!%p197_p3, %s1030_s19), 63  ;;  %v1319_v2 = vld [vmem:[%s1750_s1 + $0x28] sm:$0xff]   ;;  %s1757_s16 = smov (!%p208_p4, %s1380_s16), 1 }
   0xc   : > { %1245 = vmatprep.subr.bf16.mxu0 %v1317_v0  ;;  %1293 = vmatprep.subr.bf16.mxu1 %v1317_v0  ;;  %s1031_s24 = sshll.u32 %s1755_s19, 2  ;;  %v1320_v3 = vld [vmem:[%s1750_s1 + $0x20] sm:$0xff]   ;;  %v1321_v5 = vld [vmem:[%s1750_s1 + $0x18] sm:$0xff]   ;;  %v1322_v6 = vld [vmem:[%s1750_s1 + $0x10] sm:$0xff]   ;;  %s1034_s19 = sshll.u32 %s1757_s16, 3 }
   0xd   : > { %1246 = vmatpush3.bf16.msra.mxu0 %v1317_v0  ;;  %1301 = vmatpush3.bf16.msra.mxu1 %v1317_v0  ;;  %s1402_s27 = scalar_lea.vmem %s1749_s0, %s1031_s24  ;;  %v1323_v8 = vld [vmem:[%s1750_s1 + $0x8] sm:$0xff]   ;;  %v1324_v9 = vld [vmem:[%s1750_s1] sm:$0xff]   ;;  %s1453_s18 = scalar_lea.vmem %s1752_s3, %s1031_s24 }
   0xe   : > { %1247 = vmatprep.subr.bf16.mxu0 %v1318_v1  ;;  %1294 = vmatprep.subr.bf16.mxu1 %v1318_v1  ;;  %v1325_v4 = vld [vmem:[%s1402_s27] sm:$0xff]   ;;  %v1326_v10 = vld [vmem:[%s1402_s27 + $0x8] sm:$0xff]   ;;  %v1327_v12 = vld [vmem:[%s1402_s27 + $0x10] sm:$0xff]   ;;  %s1644_s22 = scalar_lea.vmem %s1753_s4, %s1034_s19 }
   0xf   : > { %1261 = vmatprep.mubr.bf16.mxu0 %v1325_v4  ;;  %v1333_v7 = vld [vmem:[%s1402_s27 + $0x40] sm:$0xff]   ;;  %v1334_v11 = vld [vmem:[%s1402_s27 + $0x48] sm:$0xff]   ;;  %v1335_v13 = vld [vmem:[%s1402_s27 + $0x50] sm:$0xff]  }
  0x10   : > { %1277 = vmatprep.mubr.bf16.mxu1 %v1333_v7  ;;  %v1328_v14 = vld [vmem:[%s1402_s27 + $0x18] sm:$0xff]   ;;  %v1329_v16 = vld [vmem:[%s1402_s27 + $0x20] sm:$0xff]   ;;  %v1330_v18 = vld [vmem:[%s1402_s27 + $0x28] sm:$0xff]  }
  0x11   : > { %1248 = vmatpush3.bf16.msra.mxu0 %v1318_v1  ;;  %1302 = vmatpush3.bf16.msra.mxu1 %v1318_v1  ;;  %v1336_v15 = vld [vmem:[%s1402_s27 + $0x58] sm:$0xff]   ;;  %v1337_v17 = vld [vmem:[%s1402_s27 + $0x60] sm:$0xff]   ;;  %v1338_v19 = vld [vmem:[%s1402_s27 + $0x68] sm:$0xff]  }
  0x12   : > { %1249 = vmatprep.subr.bf16.mxu0 %v1319_v2  ;;  %1295 = vmatprep.subr.bf16.mxu1 %v1319_v2  ;;  %v1331_v20 = vld [vmem:[%s1402_s27 + $0x30] sm:$0xff]   ;;  %v1332_v22 = vld [vmem:[%s1402_s27 + $0x38] sm:$0xff]   ;;  %v1438_v24 = vld [vmem:[%s1751_s2] ss:$0 sm:$0xff] }
  0x13   : > { %v1339_v21 = vld [vmem:[%s1402_s27 + $0x70] sm:$0xff]   ;;  %v1340_v23 = vld [vmem:[%s1402_s27 + $0x78] sm:$0xff]  }
  0x15   : > { %1250 = vmatpush3.bf16.msra.mxu0 %v1319_v2  ;;  %1303 = vmatpush3.bf16.msra.mxu1 %v1319_v2 }
  0x16   : > { %1251 = vmatprep.subr.bf16.mxu0 %v1320_v3  ;;  %1296 = vmatprep.subr.bf16.mxu1 %v1320_v3 }
  0x19   : > { %1252 = vmatpush3.bf16.msra.mxu0 %v1320_v3  ;;  %1304 = vmatpush3.bf16.msra.mxu1 %v1320_v3 }
  0x1a   : > { %1253 = vmatprep.subr.bf16.mxu0 %v1321_v5  ;;  %1297 = vmatprep.subr.bf16.mxu1 %v1321_v5 }
  0x1d   : > { %1254 = vmatpush3.bf16.msra.mxu0 %v1321_v5  ;;  %1305 = vmatpush3.bf16.msra.mxu1 %v1321_v5 }
  0x1e   : > { %1255 = vmatprep.subr.bf16.mxu0 %v1322_v6  ;;  %1298 = vmatprep.subr.bf16.mxu1 %v1322_v6 }
  0x21   : > { %1256 = vmatpush3.bf16.msra.mxu0 %v1322_v6  ;;  %1306 = vmatpush3.bf16.msra.mxu1 %v1322_v6 }
  0x22   : > { %1257 = vmatprep.subr.bf16.mxu0 %v1323_v8  ;;  %1299 = vmatprep.subr.bf16.mxu1 %v1323_v8 }
  0x25   : > { %1258 = vmatpush3.bf16.msra.mxu0 %v1323_v8  ;;  %1307 = vmatpush3.bf16.msra.mxu1 %v1323_v8 }
  0x26   : > { %1259 = vmatprep.subr.bf16.mxu0 %v1324_v9  ;;  %1300 = vmatprep.subr.bf16.mxu1 %v1324_v9 }
  0x29   : > { %1260 = vmatpush3.bf16.msra.mxu0 %v1324_v9  ;;  %1308 = vmatpush3.bf16.msra.mxu1 %v1324_v9 }
  0x2c   : > { %1262 = vmatmul.mubr.bf16.vlgmr.msra.gmra.mxu0 %v1326_v10  ;;  %1278 = vmatmul.mubr.bf16.vlgmr.msra.gmra.mxu1 %v1334_v11 }
  0x2d   : > { %1265 = vmatprep.mubr.bf16.mxu0 %v1327_v12  ;;  %1281 = vmatprep.mubr.bf16.mxu1 %v1335_v13 }
  0x34   : > { %1266 = vmatmul.mubr.bf16.gmra.mxu0 %v1328_v14  ;;  %1282 = vmatmul.mubr.bf16.gmra.mxu1 %v1336_v15 }
  0x35   : > { %1269 = vmatprep.mubr.bf16.mxu0 %v1329_v16  ;;  %1285 = vmatprep.mubr.bf16.mxu1 %v1337_v17 }
  0x3c   : > { %1270 = vmatmul.mubr.bf16.gmra.mxu0 %v1330_v18  ;;  %1286 = vmatmul.mubr.bf16.gmra.mxu1 %v1338_v19 }
  0x3d   : > { %1273 = vmatprep.mubr.bf16.mxu0 %v1331_v20  ;;  %1289 = vmatprep.mubr.bf16.mxu1 %v1339_v21 }
  0x44   : > { %1274 = vmatmul.mubr.bf16.gmra.mxu0 %v1332_v22  ;;  %1290 = vmatmul.mubr.bf16.gmra.mxu1 %v1340_v23 }
  0xec   : > { %v1263_v25 = vpop.f32.mrf.mxu0  ;;  %v1279_v26 = vpop.f32.mrf.mxu1 }
  0xed   : > { %v519_v27 = vadd.f32 %v1279_v26, %v1438_v24  ;;  %v455_v28 = vadd.f32 %v1263_v25, %v1438_v24 }
  0xee   : > { %v446_v29 = vpop.f32.mrf.mxu0  ;;  %v510_v30 = vpop.f32.mrf.mxu1 }
  0xef   : > { %v511_v32 = vadd.f32 %v1438_v24, %v510_v30  ;;  %v447_v34 = vadd.f32 %v1438_v24, %v446_v29  ;;  %v591_v36 = vmax.f32 %v519_v27, 0.0  ;;  %v575_v38 = vmax.f32 %v455_v28, 0.0 }
  0xf0   : > { %v1264_v31 = vpop.f32.mrf.mxu0  ;;  %v1280_v33 = vpop.f32.mrf.mxu1 }
  0xf1   : > { %v458_v35 = vadd.f32 %v1264_v31, %v1438_v24  ;;  %v522_v37 = vadd.f32 %v1280_v33, %v1438_v24  ;;  %v589_v46 = vmax.f32 %v511_v32, 0.0  ;;  %v573_v48 = vmax.f32 %v447_v34, 0.0 }
  0xf2   : > { %v449_v39 = vpop.f32.mrf.mxu0  ;;  %v513_v40 = vpop.f32.mrf.mxu1 }
  0xf3   : > { %v576_v41 = vmax.f32 %v458_v35, 0.0  ;;  %v450_v42 = vadd.f32 %v1438_v24, %v449_v39  ;;  %v592_v43 = vmax.f32 %v522_v37, 0.0  ;;  %v514_v44 = vadd.f32 %v1438_v24, %v513_v40 }
  0xf4   : > { %v1267_v45 = vpop.f32.mrf.mxu0  ;;  %v1283_v47 = vpop.f32.mrf.mxu1 }
  0xf5   : > { %v1455_v49 = vpack.c.bf16 %v576_v41, %v575_v38  ;;  %v574_v50 = vmax.f32 %v450_v42, 0.0  ;;  %v1457_v51 = vpack.c.bf16 %v592_v43, %v591_v36  ;;  %v471_v52 = vadd.f32 %v1267_v45, %v1438_v24 }
  0xf6   : > { %v462_v53 = vpop.f32.mrf.mxu0  ;;  %v590_v54 = vmax.f32 %v514_v44, 0.0  ;;  %v526_v55 = vpop.f32.mrf.mxu1  ;;  %v535_v59 = vadd.f32 %v1283_v47, %v1438_v24 }
  0xf7   : > { %1206 = vst [vmem:[%s1453_s18 + $0x8] sm:$0xff] %v1455_v49   ;;  %v1462_v56 = vpack.c.bf16 %v574_v50, %v573_v48  ;;  %1214 = vst [vmem:[%s1453_s18 + $0x48] sm:$0xff] %v1457_v51   ;;  %v463_v63 = vadd.f32 %v1438_v24, %v462_v53  ;;  %v767_v1 = vunpack.c.l.bf16 %v1455_v49  ;;  %v579_v2 = vmax.f32 %v471_v52, 0.0 }
  0xf8   : > { %v1268_v57 = vpop.f32.mrf.mxu0  ;;  %v1466_v58 = vpack.c.bf16 %v590_v54, %v589_v46  ;;  %v1284_v60 = vpop.f32.mrf.mxu1  ;;  %v527_v4 = vadd.f32 %v1438_v24, %v526_v55  ;;  %v595_v11 = vmax.f32 %v535_v59, 0.0  ;;  %v768_v25 = vunpack.c.h.bf16 %v1455_v49 }
  0xf9   : > { %1130 = vst [vmem:[%s1453_s18] sm:$0xff] %v1462_v56   ;;  %v765_v61 = vunpack.c.l.bf16 %v1462_v56  ;;  %v766_v62 = vunpack.c.h.bf16 %v1462_v56  ;;  %v474_v0 = vadd.f32 %v1268_v57, %v1438_v24  ;;  %v538_v9 = vadd.f32 %v1284_v60, %v1438_v24 }
  0xfa   : > { %v465_v3 = vpop.f32.mrf.mxu0  ;;  %1213 = vst [vmem:[%s1453_s18 + $0x40] sm:$0xff] %v1466_v58   ;;  %v529_v5 = vpop.f32.mrf.mxu1  ;;  %v593_v12 = vmax.f32 %v527_v4, 0.0  ;;  %v577_v16 = vmax.f32 %v463_v63, 0.0 }
  0xfb   : > { %v797_v6 = vadd.f32 %v766_v62, %v765_v61  ;;  %v580_v7 = vmax.f32 %v474_v0, 0.0  ;;  %v466_v8 = vadd.f32 %v1438_v24, %v465_v3  ;;  %v530_v13 = vadd.f32 %v1438_v24, %v529_v5 }
  0xfc   : > { %v1271_v10 = vpop.f32.mrf.mxu0  ;;  %v1287_v14 = vpop.f32.mrf.mxu1  ;;  %v596_v21 = vmax.f32 %v538_v9, 0.0 }
  0xfd   : > { %v798_v15 = vadd.f32 %v797_v6, %v767_v1  ;;  %v1488_v17 = vpack.c.bf16 %v580_v7, %v579_v2  ;;  %v578_v18 = vmax.f32 %v466_v8, 0.0  ;;  %v487_v19 = vadd.f32 %v1271_v10, %v1438_v24 }
  0xfe   : > { %v478_v20 = vpop.f32.mrf.mxu0  ;;  %v594_v22 = vmax.f32 %v530_v13, 0.0  ;;  %v542_v23 = vpop.f32.mrf.mxu1  ;;  %v1496_v28 = vpack.c.bf16 %v596_v21, %v595_v11  ;;  %v551_v30 = vadd.f32 %v1287_v14, %v1438_v24 }
  0xff   : > { %1208 = vst [vmem:[%s1453_s18 + $0x18] sm:$0xff] %v1488_v17   ;;  %v1494_v26 = vpack.c.bf16 %v578_v18, %v577_v16  ;;  %v799_v33 = vadd.f32 %v798_v15, %v768_v25  ;;  %v479_v34 = vadd.f32 %v1438_v24, %v478_v20  ;;  %v771_v36 = vunpack.c.l.bf16 %v1488_v17 }
 0x100   : > { %v1272_v27 = vpop.f32.mrf.mxu0  ;;  %v1498_v29 = vpack.c.bf16 %v594_v22, %v593_v12  ;;  %v1288_v31 = vpop.f32.mrf.mxu1  ;;  %v583_v37 = vmax.f32 %v487_v19, 0.0  ;;  %1216 = vst [vmem:[%s1453_s18 + $0x58] sm:$0xff] %v1496_v28   ;;  %v599_v45 = vmax.f32 %v551_v30, 0.0  ;;  %v543_v46 = vadd.f32 %v1438_v24, %v542_v23 }
 0x101   : > { %1207 = vst [vmem:[%s1453_s18 + $0x10] sm:$0xff] %v1494_v26   ;;  %v769_v32 = vunpack.c.l.bf16 %v1494_v26  ;;  %v490_v35 = vadd.f32 %v1272_v27, %v1438_v24  ;;  %v770_v40 = vunpack.c.h.bf16 %v1494_v26  ;;  %v554_v47 = vadd.f32 %v1288_v31, %v1438_v24 }
 0x102   : > { %v481_v38 = vpop.f32.mrf.mxu0  ;;  %1215 = vst [vmem:[%s1453_s18 + $0x50] sm:$0xff] %v1498_v29   ;;  %v545_v39 = vpop.f32.mrf.mxu1  ;;  %v581_v53 = vmax.f32 %v479_v34, 0.0  ;;  %v597_v60 = vmax.f32 %v543_v46, 0.0  ;;  %v772_v3 = vunpack.c.h.bf16 %v1488_v17 }
 0x103   : > { %v800_v41 = vadd.f32 %v799_v33, %v769_v32  ;;  %v584_v42 = vmax.f32 %v490_v35, 0.0  ;;  %v482_v43 = vadd.f32 %v1438_v24, %v481_v38  ;;  %v546_v48 = vadd.f32 %v1438_v24, %v545_v39 }
 0x104   : > { %v1275_v44 = vpop.f32.mrf.mxu0  ;;  %v1291_v50 = vpop.f32.mrf.mxu1  ;;  %v600_v63 = vmax.f32 %v554_v47, 0.0 }
 0x105   : > { %v801_v52 = vadd.f32 %v800_v41, %v770_v40  ;;  %v1522_v54 = vpack.c.bf16 %v584_v42, %v583_v37  ;;  %v582_v55 = vmax.f32 %v482_v43, 0.0  ;;  %v503_v57 = vadd.f32 %v1275_v44, %v1438_v24 }
 0x106   : > { %v494_v59 = vpop.f32.mrf.mxu0  ;;  %v598_v0 = vmax.f32 %v546_v48, 0.0  ;;  %v558_v2 = vpop.f32.mrf.mxu1  ;;  %v1532_v7 = vpack.c.bf16 %v600_v63, %v599_v45  ;;  %v567_v9 = vadd.f32 %v1291_v50, %v1438_v24 }
 0x107   : > { %v802_v4 = vadd.f32 %v801_v52, %v771_v36  ;;  %1210 = vst [vmem:[%s1453_s18 + $0x28] sm:$0xff] %v1522_v54   ;;  %v1530_v5 = vpack.c.bf16 %v582_v55, %v581_v53  ;;  %v495_v13 = vadd.f32 %v1438_v24, %v494_v59  ;;  %v775_v15 = vunpack.c.l.bf16 %v1522_v54 }
 0x108   : > { %v1276_v6 = vpop.f32.mrf.mxu0  ;;  %v1534_v8 = vpack.c.bf16 %v598_v0, %v597_v60  ;;  %v1292_v10 = vpop.f32.mrf.mxu1  ;;  %v587_v16 = vmax.f32 %v503_v57, 0.0  ;;  %1218 = vst [vmem:[%s1453_s18 + $0x68] sm:$0xff] %v1532_v7   ;;  %v603_v27 = vmax.f32 %v567_v9, 0.0  ;;  %v559_v30 = vadd.f32 %v1438_v24, %v558_v2 }
 0x109   : > { %1209 = vst [vmem:[%s1453_s18 + $0x20] sm:$0xff] %v1530_v5   ;;  %v773_v11 = vunpack.c.l.bf16 %v1530_v5  ;;  %v803_v12 = vadd.f32 %v802_v4, %v772_v3  ;;  %v506_v14 = vadd.f32 %v1276_v6, %v1438_v24  ;;  %v774_v20 = vunpack.c.h.bf16 %v1530_v5 }
 0x10a   : > { %v497_v18 = vpop.f32.mrf.mxu0  ;;  %1217 = vst [vmem:[%s1453_s18 + $0x60] sm:$0xff] %v1534_v8   ;;  %v561_v19 = vpop.f32.mrf.mxu1  ;;  %v570_v31 = vadd.f32 %v1292_v10, %v1438_v24  ;;  %v585_v35 = vmax.f32 %v495_v13, 0.0  ;;  %v601_v39 = vmax.f32 %v559_v30, 0.0  ;;  %v776_v43 = vunpack.c.h.bf16 %v1522_v54 }
 0x10b   : > { %v804_v21 = vadd.f32 %v803_v12, %v773_v11  ;;  %v588_v22 = vmax.f32 %v506_v14, 0.0  ;;  %v498_v23 = vadd.f32 %v1438_v24, %v497_v18  ;;  %v562_v33 = vadd.f32 %v1438_v24, %v561_v19 }
 0x10c   : > { %v604_v41 = vmax.f32 %v570_v31, 0.0  ;;  %v781_v60 = vunpack.c.l.bf16 %v1466_v58  ;;  %v782_v0 = vunpack.c.h.bf16 %v1466_v58  ;;  %v783_v4 = vunpack.c.l.bf16 %v1457_v51 }
 0x10d   : > { %v805_v34 = vadd.f32 %v804_v21, %v774_v20  ;;  %v1558_v37 = vpack.c.bf16 %v588_v22, %v587_v16  ;;  %v586_v38 = vmax.f32 %v498_v23, 0.0  ;;  %v602_v42 = vmax.f32 %v562_v33, 0.0 }
 0x10e   : > { %v1567_v45 = vpack.c.bf16 %v604_v41, %v603_v27  ;;  %v784_v9 = vunpack.c.h.bf16 %v1457_v51  ;;  %v785_v12 = vunpack.c.l.bf16 %v1498_v29  ;;  %v786_v14 = vunpack.c.h.bf16 %v1498_v29 }
 0x10f   : > { %v806_v44 = vadd.f32 %v805_v34, %v775_v15  ;;  %1212 = vst [vmem:[%s1453_s18 + $0x38] sm:$0xff] %v1558_v37   ;;  %v1565_v24 = vpack.c.bf16 %v586_v38, %v585_v35  ;;  %v1569_v46 = vpack.c.bf16 %v602_v42, %v601_v39  ;;  %v779_v53 = vunpack.c.l.bf16 %v1558_v37 }
 0x110   : > { %1220 = vst [vmem:[%s1453_s18 + $0x78] sm:$0xff] %v1567_v45   ;;  %v780_v57 = vunpack.c.h.bf16 %v1558_v37  ;;  %v787_v18 = vunpack.c.l.bf16 %v1496_v28  ;;  %v788_v21 = vunpack.c.h.bf16 %v1496_v28  ;;  %v789_v23 = vunpack.c.l.bf16 %v1534_v8 }
 0x111   : > { %1211 = vst [vmem:[%s1453_s18 + $0x30] sm:$0xff] %v1565_v24   ;;  %v777_v47 = vunpack.c.l.bf16 %v1565_v24  ;;  %v807_v48 = vadd.f32 %v806_v44, %v776_v43  ;;  %1219 = vst [vmem:[%s1453_s18 + $0x70] sm:$0xff] %v1569_v46   ;;  %v778_v50 = vunpack.c.h.bf16 %v1565_v24  ;;  %v790_v30 = vunpack.c.h.bf16 %v1534_v8 }
 0x112   : > { %v791_v33 = vunpack.c.l.bf16 %v1532_v7  ;;  %v792_v35 = vunpack.c.h.bf16 %v1532_v7  ;;  %v793_v39 = vunpack.c.l.bf16 %v1569_v46  ;;  %v794_v42 = vunpack.c.h.bf16 %v1569_v46 }
 0x113   : > { %v808_v52 = vadd.f32 %v807_v48, %v777_v47  ;;  %v795_v48 = vunpack.c.l.bf16 %v1567_v45 }
 0x115   : > { %v809_v55 = vadd.f32 %v808_v52, %v778_v50 }
 0x117   : > { %v810_v59 = vadd.f32 %v809_v55, %v779_v53  ;;  %v796_v55 = vunpack.c.h.bf16 %v1567_v45 }
 0x119   : > { %v811_v63 = vadd.f32 %v810_v59, %v780_v57 }
 0x11b   : > { %v812_v2 = vadd.f32 %v811_v63, %v781_v60 }
 0x11d   : > { %v813_v6 = vadd.f32 %v812_v2, %v782_v0 }
 0x11f   : > { %v814_v10 = vadd.f32 %v813_v6, %v783_v4 }
 0x121   : > { %v815_v13 = vadd.f32 %v814_v10, %v784_v9 }
 0x123   : > { %v816_v16 = vadd.f32 %v815_v13, %v785_v12 }
 0x125   : > { %v817_v19 = vadd.f32 %v816_v16, %v786_v14 }
 0x127   : > { %v818_v22 = vadd.f32 %v817_v19, %v787_v18 }
 0x129   : > { %v819_v27 = vadd.f32 %v818_v22, %v788_v21 }
 0x12b   : > { %v820_v31 = vadd.f32 %v819_v27, %v789_v23 }
 0x12d   : > { %v821_v34 = vadd.f32 %v820_v31, %v790_v30 }
 0x12f   : > { %v822_v38 = vadd.f32 %v821_v34, %v791_v33 }
 0x131   : > { %v823_v41 = vadd.f32 %v822_v38, %v792_v35 }
 0x133   : > { %v824_v44 = vadd.f32 %v823_v41, %v793_v39 }
 0x135   : > { %v825_v52 = vadd.f32 %v824_v44, %v794_v42 }
 0x137   : > { %v826_v59 = vadd.f32 %v825_v52, %v795_v48 }
 0x139   : > { %v827_v63 = vadd.f32 %v826_v59, %v796_v55 }
 0x13b   : > { %v828_v2 = vrot.slane %v827_v63, 4 }
 0x13d   : > { %v829_v6 = vadd.f32 %v828_v2, %v827_v63 }
 0x13f   : > { %v830_v10 = vrot.slane %v829_v6, 2 }
 0x141   : > { %v831_v13 = vadd.f32 %v830_v10, %v829_v6 }
 0x143   : > { %v832_v16 = vrot.slane %v831_v13, 1 }
 0x145   : > { %v833_v19 = vadd.f32 %v832_v16, %v831_v13 }
 0x147   : > { %867 = vst [vmem:[%s1644_s22] sm:$0x1] %v833_v19  ;;  %v1647_v22 = vmul.f32 0.00390625, %v833_v19 }
 0x149   : > { %v835_v27 = vsub.f32 %v765_v61, %v1647_v22  ;;  %v836_v31 = vsub.f32 %v766_v62, %v1647_v22  ;;  %v837_v34 = vsub.f32 %v767_v1, %v1647_v22  ;;  %v838_v44 = vsub.f32 %v768_v25, %v1647_v22 }
 0x14a   : > { %v839_v52 = vsub.f32 %v769_v32, %v1647_v22  ;;  %v840_v56 = vsub.f32 %v770_v40, %v1647_v22  ;;  %v841_v1 = vsub.f32 %v771_v36, %v1647_v22  ;;  %v842_v49 = vsub.f32 %v772_v3, %v1647_v22 }
 0x14b   : > { %v868_v38 = vmul.f32 %v835_v27, %v835_v27  ;;  %v869_v41 = vmul.f32 %v836_v31, %v836_v31  ;;  %v870_v59 = vmul.f32 %v837_v34, %v837_v34  ;;  %v871_v62 = vmul.f32 %v838_v44, %v838_v44 }
 0x14c   : > { %v872_v2 = vmul.f32 %v839_v52, %v839_v52  ;;  %v873_v25 = vmul.f32 %v840_v56, %v840_v56  ;;  %v843_v10 = vsub.f32 %v773_v11, %v1647_v22  ;;  %v874_v26 = vmul.f32 %v841_v1, %v841_v1 }
 0x14d   : > { %v900_v61 = vadd.f32 %v869_v41, %v868_v38  ;;  %v844_v13 = vsub.f32 %v774_v20, %v1647_v22  ;;  %v875_v16 = vmul.f32 %v842_v49, %v842_v49  ;;  %v845_v19 = vsub.f32 %v775_v15, %v1647_v22 }
 0x14e   : > { %v876_v17 = vmul.f32 %v843_v10, %v843_v10  ;;  %v846_v27 = vsub.f32 %v776_v43, %v1647_v22  ;;  %v847_v34 = vsub.f32 %v777_v47, %v1647_v22  ;;  %v848_v38 = vsub.f32 %v778_v50, %v1647_v22 }
 0x14f   : > { %v901_v63 = vadd.f32 %v900_v61, %v870_v59  ;;  %v877_v31 = vmul.f32 %v844_v13, %v844_v13  ;;  %v878_v5 = vmul.f32 %v845_v19, %v845_v19  ;;  %v849_v44 = vsub.f32 %v779_v53, %v1647_v22 }
 0x150   : > { %v879_v41 = vmul.f32 %v846_v27, %v846_v27  ;;  %v880_v54 = vmul.f32 %v847_v34, %v847_v34  ;;  %v850_v52 = vsub.f32 %v780_v57, %v1647_v22  ;;  %v881_v59 = vmul.f32 %v848_v38, %v848_v38 }
 0x151   : > { %v902_v6 = vadd.f32 %v901_v63, %v871_v62  ;;  %v851_v61 = vsub.f32 %v781_v60, %v1647_v22  ;;  %v882_v24 = vmul.f32 %v849_v44, %v849_v44  ;;  %v852_v56 = vsub.f32 %v782_v0, %v1647_v22 }
 0x152   : > { %v883_v62 = vmul.f32 %v850_v52, %v850_v52  ;;  %v853_v63 = vsub.f32 %v783_v4, %v1647_v22  ;;  %v854_v1 = vsub.f32 %v784_v9, %v1647_v22  ;;  %v856_v49 = vsub.f32 %v786_v14, %v1647_v22 }
 0x153   : > { %v903_v32 = vadd.f32 %v902_v6, %v872_v2  ;;  %v884_v37 = vmul.f32 %v851_v61, %v851_v61  ;;  %v885_v2 = vmul.f32 %v852_v56, %v852_v56  ;;  %v855_v6 = vsub.f32 %v785_v12, %v1647_v22 }
 0x154   : > { %v886_v58 = vmul.f32 %v853_v63, %v853_v63  ;;  %v858_v10 = vsub.f32 %v788_v21, %v1647_v22  ;;  %v860_v13 = vsub.f32 %v790_v30, %v1647_v22  ;;  %v862_v19 = vsub.f32 %v792_v35, %v1647_v22 }
 0x155   : > { %v904_v40 = vadd.f32 %v903_v32, %v873_v25  ;;  %v887_v25 = vmul.f32 %v854_v1, %v854_v1  ;;  %v857_v32 = vsub.f32 %v787_v18, %v1647_v22  ;;  %v888_v51 = vmul.f32 %v855_v6, %v855_v6 }
 0x156   : > { %v864_v27 = vsub.f32 %v794_v42, %v1647_v22  ;;  %v866_v34 = vsub.f32 %v796_v55, %v1647_v22 }
 0x157   : > { %v905_v36 = vadd.f32 %v904_v40, %v874_v26  ;;  %v889_v26 = vmul.f32 %v856_v49, %v856_v49  ;;  %v859_v40 = vsub.f32 %v789_v23, %v1647_v22  ;;  %v890_v29 = vmul.f32 %v857_v32, %v857_v32 }
 0x159   : > { %v906_v3 = vadd.f32 %v905_v36, %v875_v16  ;;  %v891_v16 = vmul.f32 %v858_v10, %v858_v10  ;;  %v861_v36 = vsub.f32 %v791_v33, %v1647_v22  ;;  %v892_v28 = vmul.f32 %v859_v40, %v859_v40 }
 0x15b   : > { %v907_v11 = vadd.f32 %v906_v3, %v876_v17  ;;  %v893_v17 = vmul.f32 %v860_v13, %v860_v13  ;;  %v863_v3 = vsub.f32 %v793_v39, %v1647_v22  ;;  %v894_v8 = vmul.f32 %v861_v36, %v861_v36 }
 0x15c   : > { %v897_v39 = vmul.f32 %v864_v27, %v864_v27 }
 0x15d   : > { %v908_v20 = vadd.f32 %v907_v11, %v877_v31  ;;  %v895_v31 = vmul.f32 %v862_v19, %v862_v19  ;;  %v865_v11 = vsub.f32 %v795_v48, %v1647_v22  ;;  %v896_v7 = vmul.f32 %v863_v3, %v863_v3 }
 0x15f   : > { %v909_v15 = vadd.f32 %v908_v20, %v878_v5  ;;  %v898_v20 = vmul.f32 %v865_v11, %v865_v11 }
 0x161   : > { %v910_v43 = vadd.f32 %v909_v15, %v879_v41  ;;  %v899_v41 = vmul.f32 %v866_v34, %v866_v34 }
 0x163   : > { %v911_v47 = vadd.f32 %v910_v43, %v880_v54 }
 0x165   : > { %v912_v50 = vadd.f32 %v911_v47, %v881_v59 }
 0x167   : > { %v913_v53 = vadd.f32 %v912_v50, %v882_v24 }
 0x169   : > { %v914_v57 = vadd.f32 %v913_v53, %v883_v62 }
 0x16b   : > { %v915_v60 = vadd.f32 %v914_v57, %v884_v37 }
 0x16d   : > { %v916_v0 = vadd.f32 %v915_v60, %v885_v2 }
 0x16f   : > { %v917_v4 = vadd.f32 %v916_v0, %v886_v58 }
 0x171   : > { %v918_v9 = vadd.f32 %v917_v4, %v887_v25 }
 0x173   : > { %v919_v12 = vadd.f32 %v918_v9, %v888_v51 }
 0x175   : > { %v920_v14 = vadd.f32 %v919_v12, %v889_v26 }
 0x177   : > { %v921_v18 = vadd.f32 %v920_v14, %v890_v29 }
 0x179   : > { %v922_v21 = vadd.f32 %v921_v18, %v891_v16 }
 0x17b   : > { %v923_v23 = vadd.f32 %v922_v21, %v892_v28 }
 0x17d   : > { %v924_v30 = vadd.f32 %v923_v23, %v893_v17 }
 0x17f   : > { %v925_v33 = vadd.f32 %v924_v30, %v894_v8 }
 0x181   : > { %v926_v35 = vadd.f32 %v925_v33, %v895_v31 }
 0x183   : > { %v927_v5 = vadd.f32 %v926_v35, %v896_v7 }
 0x185   : > { %v928_v38 = vadd.f32 %v927_v5, %v897_v39 }
 0x187   : > { %v929_v46 = vadd.f32 %v928_v38, %v898_v20 }
 0x189   : > { %v930_v42 = vadd.f32 %v929_v46, %v899_v41 }
 0x18b   : > { %v931_v15 = vrot.slane %v930_v42, 4 }
 0x18d   : > { %v932_v44 = vadd.f32 %v931_v15, %v930_v42 }
 0x18f   : > { %v933_v54 = vrot.slane %v932_v44, 2 }
 0x191   : > { %v934_v43 = vadd.f32 %v933_v54, %v932_v44 }
 0x193   : > { %v935_v52 = vrot.slane %v934_v43, 1 }
 0x195   : > { %v936_v48 = vadd.f32 %v935_v52, %v934_v43 }
 0x197   : > { %937 = vst [vmem:[%s1644_s22 + $0x1] sm:$0x1] %v936_v48 }
 0x198 PF: > { %s15_s15 = sadd.s32 1, %s1347_s15  }
 0x199   : > { %p12_p5 = scmp.ge.s32.totalorder %s15_s15, 4  }
 0x19b   :  { %14 = sbr.rel (!%p12_p5) target bundleno = 1 (0x1), region = 74 }

// kernel: cnn_block_forward.3
= control target key start
LH: loop header
LB: loop body
LE: loop exit
PB: predicated region body
PF: predicated region fallthrough
CT: control target
= control target key end

     0   :  { %s770_s1 = inlined_call_operand.vmem [shape: bf16[128,128], index: 1, kind: input, shape index: {}]   ;;  %s771_s0 = inlined_call_operand.vmem [shape: bf16[128,128], index: 0, kind: input, shape index: {}]   ;;  %s772_s2 = inlined_call_operand.vmem [shape: f32[1,128], index: 2, kind: input, shape index: {}]   ;;  %s773_s3 = inlined_call_operand.vmem [shape: bf16[128,128], index: 3, kind: output, shape index: {0}]   ;;  %s774_s4 = inlined_call_operand.vmem [shape: f32[8,128], index: 4, kind: output, shape index: {1}]  }
   0x1   :  { %v606_v0 = vld [vmem:[%s770_s1 + $0x38] sm:$0xff]   ;;  %v607_v1 = vld [vmem:[%s770_s1 + $0x30] sm:$0xff]   ;;  %v608_v2 = vld [vmem:[%s770_s1 + $0x28] sm:$0xff]  }
   0x2   :  { %558 = vmatprep.subr.bf16.mxu0 %v606_v0  ;;  %590 = vmatprep.subr.bf16.mxu1 %v606_v0  ;;  %v609_v3 = vld [vmem:[%s770_s1 + $0x20] sm:$0xff]   ;;  %v610_v5 = vld [vmem:[%s770_s1 + $0x18] sm:$0xff]   ;;  %v611_v7 = vld [vmem:[%s770_s1 + $0x10] sm:$0xff]  }
   0x3   :  { %559 = vmatpush3.bf16.msra.mxu0 %v606_v0  ;;  %598 = vmatpush3.bf16.msra.mxu1 %v606_v0  ;;  %v614_v4 = vld [vmem:[%s771_s0] sm:$0xff]   ;;  %v612_v8 = vld [vmem:[%s770_s1 + $0x8] sm:$0xff]   ;;  %v616_v12 = vld [vmem:[%s771_s0 + $0x10] sm:$0xff]  }
   0x4   :  { %560 = vmatprep.subr.bf16.mxu0 %v607_v1  ;;  %591 = vmatprep.subr.bf16.mxu1 %v607_v1  ;;  %v618_v6 = vld [vmem:[%s771_s0 + $0x20] sm:$0xff]   ;;  %v615_v10 = vld [vmem:[%s771_s0 + $0x8] sm:$0xff]   ;;  %v620_v13 = vld [vmem:[%s771_s0 + $0x30] sm:$0xff]  }
   0x5   :  { %574 = vmatprep.mubr.bf16.mxu0 %v614_v4  ;;  %582 = vmatprep.mubr.bf16.mxu1 %v618_v6  ;;  %v613_v9 = vld [vmem:[%s770_s1] sm:$0xff]   ;;  %v619_v11 = vld [vmem:[%s771_s0 + $0x28] sm:$0xff]   ;;  %v617_v14 = vld [vmem:[%s771_s0 + $0x18] sm:$0xff]  }
   0x6   :  { %v621_v15 = vld [vmem:[%s771_s0 + $0x38] sm:$0xff]   ;;  %v446_v16 = vld [vmem:[%s772_s2] ss:$0 sm:$0xff] }
   0x7   :  { %561 = vmatpush3.bf16.msra.mxu0 %v607_v1  ;;  %599 = vmatpush3.bf16.msra.mxu1 %v607_v1 }
   0x8   :  { %562 = vmatprep.subr.bf16.mxu0 %v608_v2  ;;  %592 = vmatprep.subr.bf16.mxu1 %v608_v2 }
   0xb   :  { %563 = vmatpush3.bf16.msra.mxu0 %v608_v2  ;;  %600 = vmatpush3.bf16.msra.mxu1 %v608_v2 }
   0xc   :  { %564 = vmatprep.subr.bf16.mxu0 %v609_v3  ;;  %593 = vmatprep.subr.bf16.mxu1 %v609_v3 }
   0xf   :  { %565 = vmatpush3.bf16.msra.mxu0 %v609_v3  ;;  %601 = vmatpush3.bf16.msra.mxu1 %v609_v3 }
  0x10   :  { %566 = vmatprep.subr.bf16.mxu0 %v610_v5  ;;  %594 = vmatprep.subr.bf16.mxu1 %v610_v5 }
  0x13   :  { %567 = vmatpush3.bf16.msra.mxu0 %v610_v5  ;;  %602 = vmatpush3.bf16.msra.mxu1 %v610_v5 }
  0x14   :  { %568 = vmatprep.subr.bf16.mxu0 %v611_v7  ;;  %595 = vmatprep.subr.bf16.mxu1 %v611_v7 }
  0x17   :  { %569 = vmatpush3.bf16.msra.mxu0 %v611_v7  ;;  %603 = vmatpush3.bf16.msra.mxu1 %v611_v7 }
  0x18   :  { %570 = vmatprep.subr.bf16.mxu0 %v612_v8  ;;  %596 = vmatprep.subr.bf16.mxu1 %v612_v8 }
  0x1b   :  { %571 = vmatpush3.bf16.msra.mxu0 %v612_v8  ;;  %604 = vmatpush3.bf16.msra.mxu1 %v612_v8 }
  0x1c   :  { %572 = vmatprep.subr.bf16.mxu0 %v613_v9  ;;  %597 = vmatprep.subr.bf16.mxu1 %v613_v9 }
  0x1f   :  { %573 = vmatpush3.bf16.msra.mxu0 %v613_v9  ;;  %605 = vmatpush3.bf16.msra.mxu1 %v613_v9 }
  0x22   :  { %575 = vmatmul.mubr.bf16.vlgmr.msra.gmra.mxu0 %v615_v10  ;;  %583 = vmatmul.mubr.bf16.vlgmr.msra.gmra.mxu1 %v619_v11 }
  0x23   :  { %578 = vmatprep.mubr.bf16.mxu0 %v616_v12  ;;  %586 = vmatprep.mubr.bf16.mxu1 %v620_v13 }
  0x2a   :  { %579 = vmatmul.mubr.bf16.gmra.mxu0 %v617_v14  ;;  %587 = vmatmul.mubr.bf16.gmra.mxu1 %v621_v15 }
  0xe2   :  { %v576_v17 = vpop.f32.mrf.mxu0  ;;  %v584_v18 = vpop.f32.mrf.mxu1 }
  0xe3   :  { %v227_v19 = vadd.f32 %v584_v18, %v446_v16  ;;  %v195_v20 = vadd.f32 %v576_v17, %v446_v16 }
  0xe4   :  { %v186_v21 = vpop.f32.mrf.mxu0  ;;  %v218_v22 = vpop.f32.mrf.mxu1 }
  0xe5   :  { %v219_v24 = vadd.f32 %v446_v16, %v218_v22  ;;  %v187_v26 = vadd.f32 %v446_v16, %v186_v21  ;;  %v259_v28 = vmax.f32 %v227_v19, 0.0  ;;  %v251_v30 = vmax.f32 %v195_v20, 0.0 }
  0xe6   :  { %v577_v23 = vpop.f32.mrf.mxu0  ;;  %v585_v25 = vpop.f32.mrf.mxu1 }
  0xe7   :  { %v198_v27 = vadd.f32 %v577_v23, %v446_v16  ;;  %v230_v29 = vadd.f32 %v585_v25, %v446_v16  ;;  %v257_v38 = vmax.f32 %v219_v24, 0.0  ;;  %v249_v40 = vmax.f32 %v187_v26, 0.0 }
  0xe8   :  { %v189_v31 = vpop.f32.mrf.mxu0  ;;  %v221_v32 = vpop.f32.mrf.mxu1 }
  0xe9   :  { %v252_v33 = vmax.f32 %v198_v27, 0.0  ;;  %v190_v34 = vadd.f32 %v446_v16, %v189_v31  ;;  %v260_v35 = vmax.f32 %v230_v29, 0.0  ;;  %v222_v36 = vadd.f32 %v446_v16, %v221_v32 }
  0xea   :  { %v580_v37 = vpop.f32.mrf.mxu0  ;;  %v588_v39 = vpop.f32.mrf.mxu1 }
  0xeb   :  { %v698_v41 = vpack.c.bf16 %v252_v33, %v251_v30  ;;  %v250_v42 = vmax.f32 %v190_v34, 0.0  ;;  %v700_v43 = vpack.c.bf16 %v260_v35, %v259_v28  ;;  %v211_v44 = vadd.f32 %v580_v37, %v446_v16 }
  0xec   :  { %v202_v45 = vpop.f32.mrf.mxu0  ;;  %v258_v46 = vmax.f32 %v222_v36, 0.0  ;;  %v234_v47 = vpop.f32.mrf.mxu1  ;;  %v243_v52 = vadd.f32 %v588_v39, %v446_v16 }
  0xed   :  { %535 = vst [vmem:[%s773_s3 + $0x8] sm:$0xff] %v698_v41   ;;  %v706_v48 = vpack.c.bf16 %v250_v42, %v249_v40  ;;  %539 = vst [vmem:[%s773_s3 + $0x28] sm:$0xff] %v700_v43   ;;  %v203_v49 = vadd.f32 %v446_v16, %v202_v45  ;;  %v347_v57 = vunpack.c.l.bf16 %v698_v41  ;;  %v255_v58 = vmax.f32 %v211_v44, 0.0 }
  0xee   :  { %v581_v50 = vpop.f32.mrf.mxu0  ;;  %v712_v51 = vpack.c.bf16 %v258_v46, %v257_v38  ;;  %v589_v53 = vpop.f32.mrf.mxu1  ;;  %v235_v60 = vadd.f32 %v446_v16, %v234_v47  ;;  %v263_v3 = vmax.f32 %v243_v52, 0.0  ;;  %v348_v11 = vunpack.c.h.bf16 %v698_v41 }
  0xef   :  { %499 = vst [vmem:[%s773_s3] sm:$0xff] %v706_v48   ;;  %v345_v54 = vunpack.c.l.bf16 %v706_v48  ;;  %v346_v55 = vunpack.c.h.bf16 %v706_v48  ;;  %v214_v56 = vadd.f32 %v581_v50, %v446_v16  ;;  %v246_v1 = vadd.f32 %v589_v53, %v446_v16 }
  0xf0   :  { %v205_v59 = vpop.f32.mrf.mxu0  ;;  %538 = vst [vmem:[%s773_s3 + $0x20] sm:$0xff] %v712_v51   ;;  %v237_v61 = vpop.f32.mrf.mxu1  ;;  %v253_v2 = vmax.f32 %v203_v49, 0.0  ;;  %v261_v4 = vmax.f32 %v235_v60, 0.0  ;;  %v353_v23 = vunpack.c.l.bf16 %v712_v51  ;;  %v354_v25 = vunpack.c.h.bf16 %v712_v51 }
  0xf1   :  { %v361_v62 = vadd.f32 %v346_v55, %v345_v54  ;;  %v256_v63 = vmax.f32 %v214_v56, 0.0  ;;  %v206_v0 = vadd.f32 %v446_v16, %v205_v59  ;;  %v238_v5 = vadd.f32 %v446_v16, %v237_v61 }
  0xf2   :  { %v264_v9 = vmax.f32 %v246_v1, 0.0  ;;  %v355_v27 = vunpack.c.l.bf16 %v700_v43  ;;  %v356_v29 = vunpack.c.h.bf16 %v700_v43 }
  0xf3   :  { %v362_v6 = vadd.f32 %v361_v62, %v347_v57  ;;  %v268_v7 = vpack.c.bf16 %v256_v63, %v255_v58  ;;  %v254_v8 = vmax.f32 %v206_v0, 0.0  ;;  %v262_v10 = vmax.f32 %v238_v5, 0.0 }
  0xf4   :  { %v735_v13 = vpack.c.bf16 %v264_v9, %v263_v3 }
  0xf5   :  { %537 = vst [vmem:[%s773_s3 + $0x18] sm:$0xff] %v268_v7   ;;  %v267_v12 = vpack.c.bf16 %v254_v8, %v253_v2  ;;  %v737_v14 = vpack.c.bf16 %v262_v10, %v261_v4  ;;  %v363_v16 = vadd.f32 %v362_v6, %v348_v11  ;;  %v351_v19 = vunpack.c.l.bf16 %v268_v7 }
  0xf6   :  { %541 = vst [vmem:[%s773_s3 + $0x38] sm:$0xff] %v735_v13   ;;  %v352_v21 = vunpack.c.h.bf16 %v268_v7  ;;  %v359_v35 = vunpack.c.l.bf16 %v735_v13  ;;  %v360_v37 = vunpack.c.h.bf16 %v735_v13 }
  0xf7   :  { %536 = vst [vmem:[%s773_s3 + $0x10] sm:$0xff] %v267_v12   ;;  %v349_v15 = vunpack.c.l.bf16 %v267_v12  ;;  %540 = vst [vmem:[%s773_s3 + $0x30] sm:$0xff] %v737_v14   ;;  %v350_v17 = vunpack.c.h.bf16 %v267_v12  ;;  %v357_v31 = vunpack.c.l.bf16 %v737_v14  ;;  %v358_v33 = vunpack.c.h.bf16 %v737_v14 }
  0xf9   :  { %v364_v18 = vadd.f32 %v363_v16, %v349_v15 }
  0xfb   :  { %v365_v20 = vadd.f32 %v364_v18, %v350_v17 }
  0xfd   :  { %v366_v22 = vadd.f32 %v365_v20, %v351_v19 }
  0xff   :  { %v367_v24 = vadd.f32 %v366_v22, %v352_v21 }
 0x101   :  { %v368_v26 = vadd.f32 %v367_v24, %v353_v23 }
 0x103   :  { %v369_v28 = vadd.f32 %v368_v26, %v354_v25 }
 0x105   :  { %v370_v30 = vadd.f32 %v369_v28, %v355_v27 }
 0x107   :  { %v371_v32 = vadd.f32 %v370_v30, %v356_v29 }
 0x109   :  { %v372_v34 = vadd.f32 %v371_v32, %v357_v31 }
 0x10b   :  { %v373_v36 = vadd.f32 %v372_v34, %v358_v33 }
 0x10d   :  { %v374_v38 = vadd.f32 %v373_v36, %v359_v35 }
 0x10f   :  { %v375_v39 = vadd.f32 %v374_v38, %v360_v37 }
 0x111   :  { %v376_v40 = vrot.slane %v375_v39, 4 }
 0x113   :  { %v377_v42 = vadd.f32 %v376_v40, %v375_v39 }
 0x115   :  { %v378_v44 = vrot.slane %v377_v42, 2 }
 0x117   :  { %v379_v45 = vadd.f32 %v378_v44, %v377_v42 }
 0x119   :  { %v380_v46 = vrot.slane %v379_v45, 1 }
 0x11b   :  { %v381_v43 = vadd.f32 %v380_v46, %v379_v45 }
 0x11d   :  { %v382_v47 = vmul.f32 0.0078125, %v381_v43  ;;  %399 = vst [vmem:[%s774_s4] sm:$0x1] %v381_v43 }
 0x11f   :  { %v383_v49 = vsub.f32 %v345_v54, %v382_v47  ;;  %v384_v50 = vsub.f32 %v346_v55, %v382_v47  ;;  %v385_v51 = vsub.f32 %v347_v57, %v382_v47  ;;  %v386_v56 = vsub.f32 %v348_v11, %v382_v47 }
 0x120   :  { %v387_v58 = vsub.f32 %v349_v15, %v382_v47  ;;  %v388_v61 = vsub.f32 %v350_v17, %v382_v47  ;;  %v389_v0 = vsub.f32 %v351_v19, %v382_v47  ;;  %v390_v3 = vsub.f32 %v352_v21, %v382_v47 }
 0x121   :  { %v400_v52 = vmul.f32 %v383_v49, %v383_v49  ;;  %v401_v53 = vmul.f32 %v384_v50, %v384_v50  ;;  %v402_v59 = vmul.f32 %v385_v51, %v385_v51  ;;  %v403_v62 = vmul.f32 %v386_v56, %v386_v56 }
 0x122   :  { %v404_v1 = vmul.f32 %v387_v58, %v387_v58  ;;  %v405_v54 = vmul.f32 %v388_v61, %v388_v61  ;;  %v391_v48 = vsub.f32 %v353_v23, %v382_v47  ;;  %v406_v55 = vmul.f32 %v389_v0, %v389_v0 }
 0x123   :  { %v416_v60 = vadd.f32 %v401_v53, %v400_v52  ;;  %v392_v41 = vsub.f32 %v354_v25, %v382_v47  ;;  %v407_v57 = vmul.f32 %v390_v3, %v390_v3  ;;  %v393_v7 = vsub.f32 %v355_v27, %v382_v47 }
 0x124   :  { %v408_v8 = vmul.f32 %v391_v48, %v391_v48  ;;  %v394_v10 = vsub.f32 %v356_v29, %v382_v47  ;;  %v395_v13 = vsub.f32 %v357_v31, %v382_v47  ;;  %v396_v16 = vsub.f32 %v358_v33, %v382_v47 }
 0x125   :  { %v417_v63 = vadd.f32 %v416_v60, %v402_v59  ;;  %v409_v11 = vmul.f32 %v392_v41, %v392_v41  ;;  %v410_v14 = vmul.f32 %v393_v7, %v393_v7  ;;  %v397_v19 = vsub.f32 %v359_v35, %v382_v47 }
 0x126   :  { %v411_v17 = vmul.f32 %v394_v10, %v394_v10  ;;  %v412_v20 = vmul.f32 %v395_v13, %v395_v13  ;;  %v398_v22 = vsub.f32 %v360_v37, %v382_v47  ;;  %v413_v23 = vmul.f32 %v396_v16, %v396_v16 }
 0x127   :  { %v418_v2 = vadd.f32 %v417_v63, %v403_v62  ;;  %v414_v25 = vmul.f32 %v397_v19, %v397_v19 }
 0x128   :  { %v415_v27 = vmul.f32 %v398_v22, %v398_v22 }
 0x129   :  { %v419_v4 = vadd.f32 %v418_v2, %v404_v1 }
 0x12b   :  { %v420_v5 = vadd.f32 %v419_v4, %v405_v54 }
 0x12d   :  { %v421_v6 = vadd.f32 %v420_v5, %v406_v55 }
 0x12f   :  { %v422_v9 = vadd.f32 %v421_v6, %v407_v57 }
 0x131   :  { %v423_v12 = vadd.f32 %v422_v9, %v408_v8 }
 0x133   :  { %v424_v15 = vadd.f32 %v423_v12, %v409_v11 }
 0x135   :  { %v425_v18 = vadd.f32 %v424_v15, %v410_v14 }
 0x137   :  { %v426_v21 = vadd.f32 %v425_v18, %v411_v17 }
 0x139   :  { %v427_v24 = vadd.f32 %v426_v21, %v412_v20 }
 0x13b   :  { %v428_v26 = vadd.f32 %v427_v24, %v413_v23 }
 0x13d   :  { %v429_v28 = vadd.f32 %v428_v26, %v414_v25 }
 0x13f   :  { %v430_v30 = vadd.f32 %v429_v28, %v415_v27 }
 0x141   :  { %v431_v29 = vrot.slane %v430_v30, 4 }
 0x143   :  { %v432_v32 = vadd.f32 %v431_v29, %v430_v30 }
 0x145   :  { %v433_v34 = vrot.slane %v432_v32, 2 }
 0x147   :  { %v434_v31 = vadd.f32 %v433_v34, %v432_v32 }
 0x149   :  { %v435_v36 = vrot.slane %v434_v31, 1 }
 0x14b   :  { %v436_v38 = vadd.f32 %v435_v36, %v434_v31 }
 0x14d   :  { %437 = vst [vmem:[%s774_s4 + $0x1] sm:$0x1] %v436_v38 }

</bundles_post_ra>
